<compile_context>
chip_gen: v6e
topology: v6e:2x2x1
jax: 0.10.0
libtpu: 0.0.40
codegen_flags: <defaults>
</compile_context>

<pallas_src>
import jax
import jax.numpy as jnp
from jax.experimental import pallas as pl
from jax.experimental.pallas import tpu as pltpu


def _round_up(x, m):
    return ((x + m - 1) // m) * m


def ncf_kernel(user_ref, item_ref, wu_ref, wi_h1_ref, wi_gmf_ref,
               b1_ref, w2_ref, b2_ref, wout_gmf_ref, wout_ncf_ref, out_ref):
    f32 = jnp.float32
    two_f = wu_ref.shape[1]

    user = user_ref[...]                        # (TB, 4F)      compute dtype
    item = item_ref[...]                        # (TB, 4F[+2r]) compute dtype

    # NCF tower layer 1 (+ folded item-side LoRA). Slabs go into the MXU whole
    # (zero rows in Wu/Wi mask the GMF lanes), so no input lane slicing.
    h1 = (jnp.dot(user, wu_ref[...], preferred_element_type=f32)
          + jnp.dot(item, wi_h1_ref[...], preferred_element_type=f32)
          + b1_ref[...])                        # (TB, 2F) f32
    h1 = jnp.maximum(h1, 0.0)

    w2 = w2_ref[...]
    h2 = jnp.dot(h1.astype(w2.dtype), w2, preferred_element_type=f32) + b2_ref[...]
    h2 = jnp.maximum(h2, 0.0)                   # (TB, F)  f32

    # GMF tower: corrected item embedding from a second matmul over the same
    # item slab (identity rows pass gmf_ib through; gmf_B rows add A @ B).
    gmf_items = jnp.dot(item, wi_gmf_ref[...], preferred_element_type=f32)  # (TB, 2F)
    gmf_u = user[:, :two_f].astype(f32)         # offset-0 lane view -> f32 VPU math
    gmf_h = gmf_u * gmf_items

    # Output head: VPU multiply + lane reduction (avoids an N=1 MXU matmul).
    out = (jnp.sum(gmf_h * wout_gmf_ref[...], axis=1, keepdims=True)
           + jnp.sum(h2 * wout_ncf_ref[...], axis=1, keepdims=True))        # (TB, 1)
    out_ref[...] = out.astype(out_ref.dtype)


def prepare_ncf(params, train=True, compute_dtype=jnp.bfloat16):
    """One-time prep (call once, outside the hot loop): fuse embedding tables
    into lane-dense slab tables and fold/zero-pad the dense weights so the
    kernel consumes the slabs whole.  Matmul operands are stored in
    compute_dtype; elementwise weights (biases, output head) stay f32."""
    two_f = params["gmf_emb_user"].shape[1]
    rank = params["gmf_B"].shape[0]
    cd = compute_dtype
    f32 = jnp.float32

    # Slab layouts: user = [gmf_u | ncf_u]; item = [gmf_ib | ncf_ib | gmf_A | ncf_A]
    user_table = jnp.concatenate(
        [params["gmf_emb_user"], params["ncf_emb_user"]], axis=1).astype(cd)
    if train:
        item_table = jnp.concatenate(
            [params["gmf_emb_item"], params["ncf_emb_item"],
             params["gmf_A"], params["ncf_A"]], axis=1).astype(cd)
    else:
        item_table = jnp.concatenate(
            [params["gmf_emb_item"], params["ncf_emb_item"]], axis=1).astype(cd)

    w1_u = params["w1"][:two_f]                 # (2F, 2F)  ncf_u rows
    w1_i = params["w1"][two_f:]                 # (2F, 2F)  ncf_item rows
    z2f = jnp.zeros((two_f, two_f), f32)
    zr = jnp.zeros((rank, two_f), f32)
    eye = jnp.eye(two_f, dtype=f32)

    wu = jnp.concatenate([z2f, w1_u], axis=0).astype(cd)          # (4F, 2F)
    if train:
        ncf_bw1 = params["ncf_B"] @ w1_i                          # fold LoRA into L1
        wi_h1 = jnp.concatenate([z2f, w1_i, zr, ncf_bw1], axis=0).astype(cd)
        wi_gmf = jnp.concatenate([eye, z2f, params["gmf_B"], zr], axis=0).astype(cd)
    else:
        wi_h1 = jnp.concatenate([z2f, w1_i], axis=0).astype(cd)
        wi_gmf = jnp.concatenate([eye, z2f], axis=0).astype(cd)

    return {
        "user_table": user_table, "item_table": item_table,
        "wu": wu, "wi_h1": wi_h1, "wi_gmf": wi_gmf,
        "b1": params["b1"].astype(f32),
        "w2": params["w2"].astype(cd),
        "b2": params["b2"].astype(f32),
        "wout_gmf": params["wout"][:two_f].T.astype(f32),         # (1, 2F)
        "wout_ncf": params["wout"][two_f:].T.astype(f32),         # (1, F)
    }


def ncf_forward(users, items, fused, *, block_rows=4096):
    """JAX wrapper reproducing NCF.forward(users, items, train) with the fused
    params from prepare_ncf (train/eval distinction lives in `fused`)."""
    B = users.shape[0]

    # Glue: one gather per side (plain JAX) produces lane-dense slabs.
    user_rows = fused["user_table"][users]      # (B, 4F)
    item_rows = fused["item_table"][items]      # (B, 4F[+2r])
    d_user = user_rows.shape[1]
    d_item = item_rows.shape[1]

    # Tile sizing: as large as possible (amortize the ~0.35us per-step cost);
    # keep >=2 grid steps when the batch allows so both v7x TCs get work.
    tb = max(8, _round_up(min(block_rows, B), 8))
    if pl.cdiv(B, tb) < 2 and B >= 16:
        tb = max(8, _round_up(pl.cdiv(B, 2), 8))
    grid = (pl.cdiv(B, tb),)                    # ragged last block: no jnp.pad

    weights = (fused["wu"], fused["wi_h1"], fused["wi_gmf"], fused["b1"],
               fused["w2"], fused["b2"], fused["wout_gmf"], fused["wout_ncf"])

    in_specs = ([pl.BlockSpec((tb, d_user), lambda i: (i, 0)),
                 pl.BlockSpec((tb, d_item), lambda i: (i, 0))]
                + [pl.BlockSpec(w.shape, lambda i: (0, 0)) for w in weights])

    out = pl.pallas_call(
        ncf_kernel,
        out_shape=jax.ShapeDtypeStruct((B, 1), jnp.float32),
        grid=grid,
        in_specs=in_specs,
        out_specs=pl.BlockSpec((tb, 1), lambda i: (i, 0)),
        compiler_params=pltpu.CompilerParams(
            dimension_semantics=("parallel",)),
    )(user_rows, item_rows, *weights)
    return out[:, 0]                            # squeeze(dim=-1)


def make_params(key, num_users, num_items, n_factors, rank):
    two_f = 2 * n_factors
    ks = jax.random.split(key, 10)

    def kaiming_fan_out(k, shape):
        # nn.init.kaiming_normal_(mode='fan_out'): std = sqrt(2 / fan_out)
        return jax.random.normal(k, shape, jnp.float32) * jnp.sqrt(2.0 / shape[0])

    return {
        "gmf_emb_user": kaiming_fan_out(ks[0], (num_users, two_f)),
        "ncf_emb_user": kaiming_fan_out(ks[1], (num_users, two_f)),
        "gmf_emb_item": kaiming_fan_out(ks[2], (num_items, two_f)),
        "ncf_emb_item": kaiming_fan_out(ks[3], (num_items, two_f)),
        # __init__ zero-inits A and B; use small random values so the LoRA
        # matmul path is actually exercised (synthetic init, same shapes).
        "gmf_A": jax.random.normal(ks[4], (num_items, rank), jnp.float32) * 0.1,
        "ncf_A": jax.random.normal(ks[5], (num_items, rank), jnp.float32) * 0.1,
        "gmf_B": jax.random.normal(ks[6], (rank, two_f), jnp.float32)
                 * jnp.sqrt(1.0 / rank),
        "ncf_B": jax.random.normal(ks[7], (rank, two_f), jnp.float32)
                 * jnp.sqrt(1.0 / rank),
        # ncf_hidden_layers: Linear(4F->2F), Linear(2F->F); stored as (in, out).
        "w1": jax.random.normal(ks[8], (4 * n_factors, two_f), jnp.float32)
              * jnp.sqrt(2.0 / two_f),
        "b1": jnp.zeros((1, two_f), jnp.float32),
        "w2": jax.random.normal(ks[9], (two_f, n_factors), jnp.float32)
              * jnp.sqrt(2.0 / n_factors),
        "b2": jnp.zeros((1, n_factors), jnp.float32),
        # output_layer: Linear(3F -> 1, bias=False)
        "wout": jax.random.normal(jax.random.fold_in(key, 99),
                                  (3 * n_factors, 1), jnp.float32) * jnp.sqrt(2.0),
    }


def ncf_forward_ref(users, items, params, train=True):
    """Pure-JAX f32 reference of NCF.forward."""
    gmf_u = params["gmf_emb_user"][users]
    ncf_u = params["ncf_emb_user"][users]
    if train:
        gmf_i = params["gmf_A"][items] @ params["gmf_B"] + params["gmf_emb_item"][items]
        ncf_i = params["ncf_A"][items] @ params["ncf_B"] + params["ncf_emb_item"][items]
    else:
        gmf_i = params["gmf_emb_item"][items]
        ncf_i = params["ncf_emb_item"][items]
    all_ncf = jnp.concatenate([ncf_u, ncf_i], axis=1)
    h1 = jnp.maximum(all_ncf @ params["w1"] + params["b1"], 0.0)
    h2 = jnp.maximum(h1 @ params["w2"] + params["b2"], 0.0)
    gmf_h = gmf_u * gmf_i
    h = jnp.concatenate([gmf_h, h2], axis=1)
    return (h @ params["wout"])[:, 0]


if __name__ == "__main__":
    num_users, num_items = 32, 64
    n_factors, rank = 16, 4

    key = jax.random.PRNGKey(0)
    pkey, ukey, ikey = jax.random.split(key, 3)
    params = make_params(pkey, num_users, num_items, n_factors, rank)

    # --- test 1: small batch, f32 matmul path, training (strict wiring check) ---
    batch = 8
    users = jax.random.randint(ukey, (batch,), 0, num_users, dtype=jnp.int32)
    items = jax.random.randint(ikey, (batch,), 0, num_items, dtype=jnp.int32)
    fused_tr_f32 = prepare_ncf(params, train=True, compute_dtype=jnp.float32)
    preds = jax.block_until_ready(ncf_forward(users, items, fused_tr_f32))
    ref = ncf_forward_ref(users, items, params, train=True)
    assert preds.shape == (batch,)
    assert jnp.allclose(preds, ref, rtol=1e-3, atol=1e-3), (preds, ref)

    # --- test 2: eval path (no LoRA lanes / rows in the fused slabs) ---
    fused_ev_f32 = prepare_ncf(params, train=False, compute_dtype=jnp.float32)
    preds_e = jax.block_until_ready(ncf_forward(users, items, fused_ev_f32))
    ref_e = ncf_forward_ref(users, items, params, train=False)
    assert jnp.allclose(preds_e, ref_e, rtol=1e-3, atol=1e-3), (preds_e, ref_e)

    # --- test 3: multi-tile ragged grid, bf16 slabs + bf16 matmul weights ---
    b2 = 300
    u2 = jax.random.randint(jax.random.fold_in(key, 1), (b2,), 0, num_users,
                            dtype=jnp.int32)
    i2 = jax.random.randint(jax.random.fold_in(key, 2), (b2,), 0, num_items,
                            dtype=jnp.int32)
    fused_tr_bf16 = prepare_ncf(params, train=True, compute_dtype=jnp.bfloat16)
    preds2 = jax.block_until_ready(
        ncf_forward(u2, i2, fused_tr_bf16, block_rows=128))   # grid=(3,), ragged tail
    ref2 = ncf_forward_ref(u2, i2, params, train=True)
    assert preds2.shape == (b2,)
    # Loose tolerance: bf16 weights + folded-LoRA rounding order; exact wiring
    # is already validated by the f32 tests above.
    assert jnp.allclose(preds2, ref2, rtol=5e-2, atol=5e-2), \
        float(jnp.max(jnp.abs(preds2 - ref2)))

    # --- test 4: default (large) tile with auto >=2-step split, ragged tail ---
    preds3 = jax.block_until_ready(ncf_forward(u2, i2, fused_tr_f32))  # grid=(2,)
    assert jnp.allclose(preds3, ref2, rtol=1e-3, atol=1e-3), \
        float(jnp.max(jnp.abs(preds3 - ref2)))

    print("KERNEL_OK")
</pallas_src>

<mosaic_0001>
module attributes {stable_mosaic.version = 11 : i64} {
  func.func @ncf_kernel(%arg0: i32, %arg1: memref<8x64xf32, #tpu.memory_space<vmem>>, %arg2: memref<8x72xf32, #tpu.memory_space<vmem>>, %arg3: memref<64x32xf32, #tpu.memory_space<vmem>>, %arg4: memref<72x32xf32, #tpu.memory_space<vmem>>, %arg5: memref<72x32xf32, #tpu.memory_space<vmem>>, %arg6: memref<1x32xf32, #tpu.memory_space<vmem>>, %arg7: memref<32x16xf32, #tpu.memory_space<vmem>>, %arg8: memref<1x16xf32, #tpu.memory_space<vmem>>, %arg9: memref<1x32xf32, #tpu.memory_space<vmem>>, %arg10: memref<1x16xf32, #tpu.memory_space<vmem>>, %arg11: memref<8x1xf32, #tpu.memory_space<vmem>>) attributes {dimension_semantics = [#tpu.dimension_semantics<parallel>], iteration_bounds = array<i64: 1>, scalar_prefetch = 0 : i64, scratch_operands = 0 : i64, tpu.core_type = #tpu.core_type<tc>, window_params = [{transform_indices = @transform_0, window_bounds = array<i64: 8, 64>}, {transform_indices = @transform_1, window_bounds = array<i64: 8, 72>}, {pipeline_mode = #tpu.pipeline_mode<synchronous>, transform_indices = @transform_2, window_bounds = array<i64: 64, 32>}, {pipeline_mode = #tpu.pipeline_mode<synchronous>, transform_indices = @transform_3, window_bounds = array<i64: 72, 32>}, {pipeline_mode = #tpu.pipeline_mode<synchronous>, transform_indices = @transform_4, window_bounds = array<i64: 72, 32>}, {pipeline_mode = #tpu.pipeline_mode<synchronous>, transform_indices = @transform_5, window_bounds = array<i64: 1, 32>}, {pipeline_mode = #tpu.pipeline_mode<synchronous>, transform_indices = @transform_6, window_bounds = array<i64: 32, 16>}, {pipeline_mode = #tpu.pipeline_mode<synchronous>, transform_indices = @transform_7, window_bounds = array<i64: 1, 16>}, {pipeline_mode = #tpu.pipeline_mode<synchronous>, transform_indices = @transform_8, window_bounds = array<i64: 1, 32>}, {pipeline_mode = #tpu.pipeline_mode<synchronous>, transform_indices = @transform_9, window_bounds = array<i64: 1, 16>}, {transform_indices = @transform_10, window_bounds = array<i64: 8, 1>}]} {
    %c0 = arith.constant 0 : index
    %c0_0 = arith.constant 0 : index
    %0 = vector.load %arg1[%c0, %c0_0] : memref<8x64xf32, #tpu.memory_space<vmem>>, vector<8x64xf32>
    %c0_1 = arith.constant 0 : index
    %c0_2 = arith.constant 0 : index
    %1 = vector.load %arg2[%c0_1, %c0_2] : memref<8x72xf32, #tpu.memory_space<vmem>>, vector<8x72xf32>
    %c0_3 = arith.constant 0 : index
    %c0_4 = arith.constant 0 : index
    %2 = vector.load %arg3[%c0_3, %c0_4] : memref<64x32xf32, #tpu.memory_space<vmem>>, vector<64x32xf32>
    %cst = arith.constant dense<0.000000e+00> : vector<8x32xf32>
    %3 = tpu.matmul %0, %2, %cst {dimension_numbers = #tpu.dot_dimension_numbers<[1], [0], [0], [1], [0, 0, 1, 1], [], []>} : vector<8x64xf32>, vector<64x32xf32>, vector<8x32xf32> -> vector<8x32xf32>
    %c0_5 = arith.constant 0 : index
    %c0_6 = arith.constant 0 : index
    %4 = vector.load %arg4[%c0_5, %c0_6] : memref<72x32xf32, #tpu.memory_space<vmem>>, vector<72x32xf32>
    %cst_7 = arith.constant dense<0.000000e+00> : vector<8x32xf32>
    %5 = tpu.matmul %1, %4, %cst_7 {dimension_numbers = #tpu.dot_dimension_numbers<[1], [0], [0], [1], [0, 0, 1, 1], [], []>} : vector<8x72xf32>, vector<72x32xf32>, vector<8x32xf32> -> vector<8x32xf32>
    %6 = arith.addf %3, %5 : vector<8x32xf32>
    %c0_8 = arith.constant 0 : index
    %c0_9 = arith.constant 0 : index
    %7 = vector.load %arg6[%c0_8, %c0_9] : memref<1x32xf32, #tpu.memory_space<vmem>>, vector<1x32xf32>
    %8 = vector.broadcast %7 : vector<1x32xf32> to vector<8x32xf32>
    %9 = arith.addf %6, %8 : vector<8x32xf32>
    %cst_10 = arith.constant 0.000000e+00 : f32
    %10 = vector.broadcast %cst_10 : f32 to vector<8x32xf32>
    %11 = arith.maximumf %9, %10 : vector<8x32xf32>
    %c0_11 = arith.constant 0 : index
    %c0_12 = arith.constant 0 : index
    %12 = vector.load %arg7[%c0_11, %c0_12] : memref<32x16xf32, #tpu.memory_space<vmem>>, vector<32x16xf32>
    %cst_13 = arith.constant dense<0.000000e+00> : vector<8x16xf32>
    %13 = tpu.matmul %11, %12, %cst_13 {dimension_numbers = #tpu.dot_dimension_numbers<[1], [0], [0], [1], [0, 0, 1, 1], [], []>} : vector<8x32xf32>, vector<32x16xf32>, vector<8x16xf32> -> vector<8x16xf32>
    %c0_14 = arith.constant 0 : index
    %c0_15 = arith.constant 0 : index
    %14 = vector.load %arg8[%c0_14, %c0_15] : memref<1x16xf32, #tpu.memory_space<vmem>>, vector<1x16xf32>
    %15 = vector.broadcast %14 : vector<1x16xf32> to vector<8x16xf32>
    %16 = arith.addf %13, %15 : vector<8x16xf32>
    %cst_16 = arith.constant 0.000000e+00 : f32
    %17 = vector.broadcast %cst_16 : f32 to vector<8x16xf32>
    %18 = arith.maximumf %16, %17 : vector<8x16xf32>
    %c0_17 = arith.constant 0 : index
    %c0_18 = arith.constant 0 : index
    %19 = vector.load %arg5[%c0_17, %c0_18] : memref<72x32xf32, #tpu.memory_space<vmem>>, vector<72x32xf32>
    %cst_19 = arith.constant dense<0.000000e+00> : vector<8x32xf32>
    %20 = tpu.matmul %1, %19, %cst_19 {dimension_numbers = #tpu.dot_dimension_numbers<[1], [0], [0], [1], [0, 0, 1, 1], [], []>} : vector<8x72xf32>, vector<72x32xf32>, vector<8x32xf32> -> vector<8x32xf32>
    %21 = vector.extract_strided_slice %0 {offsets = [0, 0], sizes = [8, 32], strides = [1, 1]} : vector<8x64xf32> to vector<8x32xf32>
    %22 = arith.mulf %21, %20 : vector<8x32xf32>
    %c0_20 = arith.constant 0 : index
    %c0_21 = arith.constant 0 : index
    %23 = vector.load %arg9[%c0_20, %c0_21] : memref<1x32xf32, #tpu.memory_space<vmem>>, vector<1x32xf32>
    %24 = vector.broadcast %23 : vector<1x32xf32> to vector<8x32xf32>
    %25 = arith.mulf %22, %24 : vector<8x32xf32>
    %cst_22 = arith.constant dense<0.000000e+00> : vector<8xf32>
    %26 = vector.multi_reduction <add>, %25, %cst_22 [1] : vector<8x32xf32> to vector<8xf32>
    %27 = vector.shape_cast %26 : vector<8xf32> to vector<8x1xf32>
    %c0_23 = arith.constant 0 : index
    %c0_24 = arith.constant 0 : index
    %28 = vector.load %arg10[%c0_23, %c0_24] : memref<1x16xf32, #tpu.memory_space<vmem>>, vector<1x16xf32>
    %29 = vector.broadcast %28 : vector<1x16xf32> to vector<8x16xf32>
    %30 = arith.mulf %18, %29 : vector<8x16xf32>
    %cst_25 = arith.constant dense<0.000000e+00> : vector<8xf32>
    %31 = vector.multi_reduction <add>, %30, %cst_25 [1] : vector<8x16xf32> to vector<8xf32>
    %32 = vector.shape_cast %31 : vector<8xf32> to vector<8x1xf32>
    %33 = arith.addf %27, %32 : vector<8x1xf32>
    %c0_26 = arith.constant 0 : index
    %c0_27 = arith.constant 0 : index
    %34 = vector.load %arg11[%c0_26, %c0_27] : memref<8x1xf32, #tpu.memory_space<vmem>>, vector<8x1xf32>
    tpu.vector_store %arg11[%c0_26, %c0_27], %33 {strides = array<i32>} : memref<8x1xf32, #tpu.memory_space<vmem>>, vector<8x1xf32>,
    return
  }
  func.func @transform_0(%arg0: i32) -> (i32, i32) {
    %c0_i32 = arith.constant 0 : i32
    %c0_i32_0 = arith.constant 0 : i32
    return %arg0, %c0_i32 : i32, i32
  }
  func.func @transform_1(%arg0: i32) -> (i32, i32) {
    %c0_i32 = arith.constant 0 : i32
    %c0_i32_0 = arith.constant 0 : i32
    return %arg0, %c0_i32 : i32, i32
  }
  func.func @transform_2(%arg0: i32) -> (i32, i32) {
    %c0_i32 = arith.constant 0 : i32
    %c0_i32_0 = arith.constant 0 : i32
    %c0_i32_1 = arith.constant 0 : i32
    return %c0_i32, %c0_i32_0 : i32, i32
  }
  func.func @transform_3(%arg0: i32) -> (i32, i32) {
    %c0_i32 = arith.constant 0 : i32
    %c0_i32_0 = arith.constant 0 : i32
    %c0_i32_1 = arith.constant 0 : i32
    return %c0_i32, %c0_i32_0 : i32, i32
  }
  func.func @transform_4(%arg0: i32) -> (i32, i32) {
    %c0_i32 = arith.constant 0 : i32
    %c0_i32_0 = arith.constant 0 : i32
    %c0_i32_1 = arith.constant 0 : i32
    return %c0_i32, %c0_i32_0 : i32, i32
  }
  func.func @transform_5(%arg0: i32) -> (i32, i32) {
    %c0_i32 = arith.constant 0 : i32
    %c0_i32_0 = arith.constant 0 : i32
    %c0_i32_1 = arith.constant 0 : i32
    return %c0_i32, %c0_i32_0 : i32, i32
  }
  func.func @transform_6(%arg0: i32) -> (i32, i32) {
    %c0_i32 = arith.constant 0 : i32
    %c0_i32_0 = arith.constant 0 : i32
    %c0_i32_1 = arith.constant 0 : i32
    return %c0_i32, %c0_i32_0 : i32, i32
  }
  func.func @transform_7(%arg0: i32) -> (i32, i32) {
    %c0_i32 = arith.constant 0 : i32
    %c0_i32_0 = arith.constant 0 : i32
    %c0_i32_1 = arith.constant 0 : i32
    return %c0_i32, %c0_i32_0 : i32, i32
  }
  func.func @transform_8(%arg0: i32) -> (i32, i32) {
    %c0_i32 = arith.constant 0 : i32
    %c0_i32_0 = arith.constant 0 : i32
    %c0_i32_1 = arith.constant 0 : i32
    return %c0_i32, %c0_i32_0 : i32, i32
  }
  func.func @transform_9(%arg0: i32) -> (i32, i32) {
    %c0_i32 = arith.constant 0 : i32
    %c0_i32_0 = arith.constant 0 : i32
    %c0_i32_1 = arith.constant 0 : i32
    return %c0_i32, %c0_i32_0 : i32, i32
  }
  func.func @transform_10(%arg0: i32) -> (i32, i32) {
    %c0_i32 = arith.constant 0 : i32
    %c0_i32_0 = arith.constant 0 : i32
    return %arg0, %c0_i32 : i32, i32
  }
}

</mosaic_0001>

<bundles_post_ra>
// kernel: tpu_custom_call.1
= control target key start
LH: loop header
LB: loop body
LE: loop exit
PB: predicated region body
PF: predicated region fallthrough
CT: control target
= control target key end

     0   :  { %v523_v0 = vmov 0.0   ;;  %vm128_vm0 = vcmask 523264   ;;  %vm524_vm1 = vmmov 0   ;;  %vm54_vm2 = vcmask 588800   ;;  %s735_s3 = inlined_call_operand.vmem [shape: f32[72,32], index: 3, kind: input, shape index: {}]   ;;  %s736_s2 = inlined_call_operand.vmem [shape: f32[64,32], index: 2, kind: input, shape index: {}]   ;;  %s737_s0 = inlined_call_operand.vmem [shape: f32[8,64], index: 0, kind: input, shape index: {}]   ;;  %s738_s1 = inlined_call_operand.vmem [shape: f32[8,72], index: 1, kind: input, shape index: {}]   ;;  %s739_s4 = inlined_call_operand.vmem [shape: f32[72,32], index: 4, kind: input, shape index: {}]   ;;  %s740_s6 = inlined_call_operand.vmem [shape: f32[32,16], index: 6, kind: input, shape index: {}]   ;;  %s741_s5 = inlined_call_operand.vmem [shape: f32[1,32], index: 5, kind: input, shape index: {}]   ;;  %s742_s8 = inlined_call_operand.vmem [shape: f32[1,32], index: 8, kind: input, shape index: {}]   ;;  %s743_s7 = inlined_call_operand.vmem [shape: f32[1,16], index: 7, kind: input, shape index: {}]   ;;  %s744_s9 = inlined_call_operand.vmem [shape: f32[1,16], index: 9, kind: input, shape index: {}]   ;;  %s745_s10 = inlined_call_operand.vmem [shape: f32[8,1], index: 10, kind: output, shape index: {}]  }
   0x1   :  { %449 = vmatprep.subr.mxu0 %v523_v0  ;;  %470 = vmatprep.subr.mxu1 %v523_v0  ;;  %v53_v1 = vld [vmem:[%s735_s3 + $0x40] sm:$0xff]  ;;  %v44_v2 = vld [vmem:[%s736_s2 + $0x38] sm:$0xff]  ;;  %v43_v4 = vld [vmem:[%s736_s2 + $0x30] sm:$0xff]  ;;  %vm222_vm3 = vcmask 261120   ;;  %vm396_vm4 = vcmask 130048   ;;  %vm401_vm5 = vcmask 7168  }
   0x2   :  { %v52_v3 = vld [vmem:[%s735_s3 + $0x38] sm:$0xff]  ;;  %450 = vmatpush3.msra.mxu0 %v53_v1  ;;  %471 = vmatpush3.msra.mxu1 %v44_v2  ;;  %v51_v5 = vld [vmem:[%s735_s3 + $0x30] sm:$0xff]  ;;  %v42_v6 = vld [vmem:[%s736_s2 + $0x28] sm:$0xff] }
   0x3   :  { %451 = vmatprep.subr.mxu0 %v523_v0  ;;  %472 = vmatprep.subr.mxu1 %v523_v0  ;;  %v50_v7 = vld [vmem:[%s735_s3 + $0x28] sm:$0xff]  ;;  %v41_v8 = vld [vmem:[%s736_s2 + $0x20] sm:$0xff]  ;;  %v40_v10 = vld [vmem:[%s736_s2 + $0x18] sm:$0xff] }
   0x4   :  { %452 = vmatpush3.msra.mxu0 %v52_v3  ;;  %473 = vmatpush3.msra.mxu1 %v43_v4  ;;  %v49_v9 = vld [vmem:[%s735_s3 + $0x20] sm:$0xff]  ;;  %v48_v11 = vld [vmem:[%s735_s3 + $0x18] sm:$0xff]  ;;  %v39_v12 = vld [vmem:[%s736_s2 + $0x10] sm:$0xff] }
   0x5   :  { %453 = vmatprep.subr.mxu0 %v523_v0  ;;  %474 = vmatprep.subr.mxu1 %v523_v0  ;;  %v47_v13 = vld [vmem:[%s735_s3 + $0x10] sm:$0xff]  ;;  %v38_v14 = vld [vmem:[%s736_s2 + $0x8] sm:$0xff]  ;;  %v37_v16 = vld [vmem:[%s736_s2] sm:$0xff] }
   0x6   :  { %454 = vmatpush3.msra.mxu0 %v51_v5  ;;  %475 = vmatpush3.msra.mxu1 %v42_v6  ;;  %v46_v15 = vld [vmem:[%s735_s3 + $0x8] sm:$0xff]  ;;  %v647_v17 = vld [vmem:[%s737_s0] sm:$0xff]  ;;  %v304_v21 = vld [vmem:[%s739_s4 + $0x38] sm:$0xff] }
   0x7   :  { %455 = vmatprep.subr.mxu0 %v523_v0  ;;  %476 = vmatprep.subr.mxu1 %v523_v0  ;;  %v45_v18 = vld [vmem:[%s735_s3] sm:$0xff]  ;;  %v303_v22 = vld [vmem:[%s739_s4 + $0x30] sm:$0xff]  ;;  %v302_v23 = vld [vmem:[%s739_s4 + $0x28] sm:$0xff] }
   0x8   :  { %456 = vmatpush3.msra.mxu0 %v50_v7  ;;  %477 = vmatpush3.msra.mxu1 %v41_v8  ;;  %v36_v19 = vld [vmem:[%s738_s1] sm:$0xff]  ;;  %v300_v25 = vld [vmem:[%s739_s4 + $0x18] sm:$0xff]  ;;  %v299_v26 = vld [vmem:[%s739_s4 + $0x10] sm:$0xff] }
   0x9   :  { %457 = vmatprep.subr.mxu0 %v523_v0  ;;  %478 = vmatprep.subr.mxu1 %v523_v0  ;;  %v305_v20 = vld [vmem:[%s739_s4 + $0x40] sm:$0xff]  ;;  %v214_v27 = vld [vmem:[%s740_s6 + $0x18] sm:$0xff]  ;;  %v298_v28 = vld [vmem:[%s739_s4 + $0x8] sm:$0xff] }
   0xa   :  { %458 = vmatpush3.msra.mxu0 %v49_v9  ;;  %479 = vmatpush3.msra.mxu1 %v40_v10  ;;  %v301_v24 = vld [vmem:[%s739_s4 + $0x20] sm:$0xff]  ;;  %v213_v29 = vld [vmem:[%s740_s6 + $0x10] sm:$0xff]  ;;  %v212_v31 = vld [vmem:[%s740_s6 + $0x8] sm:$0xff] }
   0xb   :  { %459 = vmatprep.subr.mxu0 %v523_v0  ;;  %480 = vmatprep.subr.mxu1 %v523_v0  ;;  %v297_v30 = vld [vmem:[%s739_s4] sm:$0xff] }
   0xc   :  { %460 = vmatpush3.msra.mxu0 %v48_v11  ;;  %481 = vmatpush3.msra.mxu1 %v39_v12  ;;  %v211_v32 = vld [vmem:[%s740_s6] sm:$0xff] }
   0xd   :  { %461 = vmatprep.subr.mxu0 %v523_v0  ;;  %482 = vmatprep.subr.mxu1 %v523_v0  ;;  %v409_v35 = vld [vmem:[%s741_s5] ss:$0 sm:$0xff] }
   0xe   :  { %462 = vmatpush3.msra.mxu0 %v47_v13  ;;  %483 = vmatpush3.msra.mxu1 %v38_v14  ;;  %v413_v44 = vld [vmem:[%s742_s8] ss:$0 sm:$0xff] }
   0xf   :  { %463 = vmatprep.subr.mxu0 %v523_v0  ;;  %484 = vmatprep.subr.mxu1 %v523_v0  ;;  %v410_v47 = vld [vmem:[%s743_s7] ss:$0 sm:$0xff] }
  0x10   :  { %464 = vmatpush3.msra.mxu0 %v46_v15  ;;  %485 = vmatpush3.msra.mxu1 %v37_v16  ;;  %v414_v51 = vld [vmem:[%s744_s9] ss:$0 sm:$0xff] }
  0x11   :  { %486 = vmatprep.mubr.msk.f32.mxu1 %vm524_vm1, %v523_v0  ;;  %465 = vmatprep.subr.mxu0 %v523_v0 }
  0x12   :  { %487 = vmatmul.mubr.msk.f32.vlgmr.msra.gmra.mxu1 %vm128_vm0, %v647_v17  ;;  %466 = vmatpush3.msra.mxu0 %v45_v18 }
  0x13   :  { %467 = vmatprep.mubr.msk.f32.mxu0 %vm524_vm1, %v523_v0  ;;  %500 = vmatprep.subr.mxu0 %v523_v0 }
  0x14   :  { %468 = vmatmul.mubr.msk.f32.vlgmr.msra.gmra.mxu0 %vm54_vm2, %v36_v19  ;;  %489 = vmatprep.subr.mxu1 %v523_v0 }
  0x15   :  { %501 = vmatpush3.msra.mxu0 %v305_v20  ;;  %518 = vmatprep.mubr.msk.f32.mxu0 %vm524_vm1, %v523_v0 }
  0x16   :  { %502 = vmatprep.subr.mxu0 %v523_v0  ;;  %497 = vmatprep.mubr.msk.f32.mxu1 %vm524_vm1, %v523_v0 }
  0x17   :  { %503 = vmatpush3.msra.mxu0 %v304_v21  ;;  %490 = vmatpush3.msra.mxu1 %v214_v27 }
  0x18   :  { %504 = vmatprep.subr.mxu0 %v523_v0  ;;  %491 = vmatprep.subr.mxu1 %v523_v0 }
  0x19   :  { %505 = vmatpush3.msra.mxu0 %v303_v22  ;;  %492 = vmatpush3.msra.mxu1 %v213_v29 }
  0x1a   :  { %506 = vmatprep.subr.mxu0 %v523_v0  ;;  %493 = vmatprep.subr.mxu1 %v523_v0 }
  0x1b   :  { %507 = vmatpush3.msra.mxu0 %v302_v23  ;;  %494 = vmatpush3.msra.mxu1 %v212_v31 }
  0x1c   :  { %508 = vmatprep.subr.mxu0 %v523_v0  ;;  %495 = vmatprep.subr.mxu1 %v523_v0 }
  0x1d   :  { %509 = vmatpush3.msra.mxu0 %v301_v24  ;;  %496 = vmatpush3.msra.mxu1 %v211_v32 }
  0x1e   :  { %510 = vmatprep.subr.mxu0 %v523_v0 }
  0x1f   :  { %511 = vmatpush3.msra.mxu0 %v300_v25 }
  0x20   :  { %512 = vmatprep.subr.mxu0 %v523_v0 }
  0x21   :  { %513 = vmatpush3.msra.mxu0 %v299_v26 }
  0x22   :  { %514 = vmatprep.subr.mxu0 %v523_v0 }
  0x23   :  { %515 = vmatpush3.msra.mxu0 %v298_v28 }
  0x24   :  { %516 = vmatprep.subr.mxu0 %v523_v0 }
  0x25   :  { %517 = vmatpush3.msra.mxu0 %v297_v30 }
  0x26   :  { %519 = vmatmul.mubr.msk.f32.vlgmr.msra.gmra.mxu0 %vm54_vm2, %v36_v19 }
  0xd2   :  { %v198_v33 = vpop.f32.mrf.mxu1 }
  0xd4   :  { %v124_v34 = vpop.f32.mrf.mxu0  ;;  %v488_v36 = vpop.f32.mrf.mxu1 }
  0xd5   :  { %v199_v37 = vadd.f32 %v198_v33, %v124_v34 }
  0xd6   :  { %v469_v38 = vpop.f32.mrf.mxu0 }
  0xd7   :  { %v209_v39 = vadd.f32 %v409_v35, %v199_v37 }
  0xd9   :  { %v210_v40 = vmax.f32 %v209_v39, 0.0 }
  0xdb   :  { %498 = vmatmul.mubr.msk.f32.vlgmr.msra.gmra.mxu1 %vm222_vm3, %v210_v40 }
  0xe6   :  { %v372_v41 = vpop.f32.mrf.mxu0 }
  0xe7   :  { %v376_v42 = vmul.f32 %v372_v41, %v647_v17 }
  0xe8   :  { %v520_v43 = vpop.f32.mrf.mxu0 }
  0xe9   :  { %v384_v45 = vmul.f32 %v413_v44, %v376_v42 }
  0xeb   :  { %v385_v46 = vsel %vm222_vm3, %v384_v45, 0.0 }
  0xec   :  { %386 = vadd.xlane.f32.xlu0 %v385_v46 }
 0x175   :  { %v387_v55 = vpop.xlane.xlu0 %386 }
 0x19b   :  { %v292_v48 = vpop.f32.mrf.mxu1 }
 0x19c   :  { %v293_v49 = vadd.f32 %v410_v47, %v292_v48 }
 0x19d   :  { %v499_v50 = vpop.f32.mrf.mxu1 }
 0x19e   :  { %v296_v52 = vmax.f32 %v293_v49, 0.0 }
 0x1a0   :  { %v395_v53 = vmul.f32 %v414_v51, %v296_v52 }
 0x1a2   :  { %v397_v54 = vsel %vm396_vm4, %v395_v53, 0.0 }
 0x1a3   :  { %398 = vadd.xlane.f32.xlu0 %v397_v54 }
 0x22c   :  { %v399_v56 = vpop.xlane.xlu0 %398 }
 0x22d   :  { %v400_v57 = vadd.f32 %v399_v56, %v387_v55 }
 0x22f   :  { %402 = vst.msk [vmem:[%s745_s10] sm:$0xff] %vm401_vm5, %v400_v57 }

</bundles_post_ra>
